<compile_context>
chip_gen: v5e
topology: v5e:2x2
jax: 0.10.0
libtpu: 0.0.40
codegen_flags: <defaults>
</compile_context>

<pallas_src>
import math

import jax
import jax.numpy as jnp
from jax.experimental import pallas as pl
from jax.experimental.pallas import tpu as pltpu


def _mha_kernel(q_ref, k_ref, v_ref,
                wq_ref, wk_ref, wv_ref,
                bq_ref, bk_ref, bv_ref,
                woh_ref, bo_ref, o_ref):
    # q_ref/k_ref/v_ref: (1, S, D)   one batch element
    # wq/wk/wv         : (D, D)      input-major linear weights (x @ W + b)
    # bq/bk/bv/bo      : (1, D)
    # woh_ref          : (H, dk, D)  output projection, head-major rows of Wo
    # o_ref            : (1, S, D)
    _, S, D = q_ref.shape
    H, dk, _ = woh_ref.shape
    scale = 1.0 / math.sqrt(dk)

    # Fused Q/K/V projections: three (S, D) @ (D, D) MXU matmuls.
    q = jnp.dot(q_ref[0], wq_ref[...], preferred_element_type=jnp.float32) + bq_ref[...]
    k = jnp.dot(k_ref[0], wk_ref[...], preferred_element_type=jnp.float32) + bk_ref[...]
    v = jnp.dot(v_ref[0], wv_ref[...], preferred_element_type=jnp.float32) + bv_ref[...]

    # Per-head scaled dot-product attention with the output projection folded
    # in per head (no concat over heads needed).
    acc = jnp.zeros((S, D), jnp.float32)
    for h in range(H):                      # H is small and static -> unrolled
        sl = slice(h * dk, (h + 1) * dk)
        qh, kh, vh = q[:, sl], k[:, sl], v[:, sl]          # (S, dk) each
        scores = jax.lax.dot_general(                       # (S, S) = qh @ kh^T
            qh, kh, (((1,), (1,)), ((), ())),
            preferred_element_type=jnp.float32) * scale
        # TODO(synk): optional attention mask not implemented (mask=None path).
        m = jnp.max(scores, axis=-1, keepdims=True)
        e = jnp.exp(scores - m)
        p = e / jnp.sum(e, axis=-1, keepdims=True)
        # TODO(synk): attention dropout (p=0.1) omitted — inference semantics.
        ctx = jnp.dot(p, vh, preferred_element_type=jnp.float32)          # (S, dk)
        acc = acc + jnp.dot(ctx, woh_ref[h], preferred_element_type=jnp.float32)

    # Single vectorized epilogue: bias + cast + store for the whole block.
    o_ref[0] = (acc + bo_ref[...]).astype(o_ref.dtype)


def mha_forward(query, key, value, params, num_heads):
    """Forward of _MultiHeadedAttention_ (mask=None, eval mode)."""
    wq, bq, wk, bk, wv, bv, wo, bo = params
    B, S, D = query.shape
    assert D % num_heads == 0
    dk = D // num_heads

    # Layout plumbing in the wrapper (free): head-major rows of Wo, 2-D biases.
    woh = wo.reshape(num_heads, dk, D)
    bq2, bk2, bv2, bo2 = (b.reshape(1, D) for b in (bq, bk, bv, bo))

    return pl.pallas_call(
        _mha_kernel,
        out_shape=jax.ShapeDtypeStruct((B, S, D), query.dtype),
        grid=(B,),
        in_specs=[
            pl.BlockSpec((1, S, D), lambda b: (b, 0, 0)),
            pl.BlockSpec((1, S, D), lambda b: (b, 0, 0)),
            pl.BlockSpec((1, S, D), lambda b: (b, 0, 0)),
            pl.BlockSpec((D, D), lambda b: (0, 0)),
            pl.BlockSpec((D, D), lambda b: (0, 0)),
            pl.BlockSpec((D, D), lambda b: (0, 0)),
            pl.BlockSpec((1, D), lambda b: (0, 0)),
            pl.BlockSpec((1, D), lambda b: (0, 0)),
            pl.BlockSpec((1, D), lambda b: (0, 0)),
            pl.BlockSpec((num_heads, dk, D), lambda b: (0, 0, 0)),
            pl.BlockSpec((1, D), lambda b: (0, 0)),
        ],
        out_specs=pl.BlockSpec((1, S, D), lambda b: (b, 0, 0)),
        compiler_params=pltpu.CompilerParams(
            dimension_semantics=("parallel",)),   # batch is independent -> v7x 2 TCs
    )(query, key, value, wq, wk, wv, bq2, bk2, bv2, woh, bo2)


def _reference(query, key, value, params, num_heads):
    """Pure-JAX reference (same math as the PyTorch module, eval mode)."""
    wq, bq, wk, bk, wv, bv, wo, bo = params
    B, S, D = query.shape
    dk = D // num_heads

    def split_heads(x):
        return x.reshape(B, S, num_heads, dk).transpose(0, 2, 1, 3)  # (B,H,S,dk)

    Q = split_heads(query @ wq + bq)
    K = split_heads(key @ wk + bk)
    V = split_heads(value @ wv + bv)
    scores = jnp.einsum("bhqd,bhkd->bhqk", Q, K) / math.sqrt(dk)
    p = jax.nn.softmax(scores, axis=-1)
    ctx = jnp.einsum("bhqk,bhkd->bhqd", p, V)
    ctx = ctx.transpose(0, 2, 1, 3).reshape(B, S, D)
    return ctx @ wo + bo


def make_params(key, d_model):
    """Deterministic synthetic parameters. Weights are (in, out): y = x @ W + b."""
    ks = jax.random.split(key, 8)
    s = 1.0 / math.sqrt(d_model)
    wq = s * jax.random.normal(ks[0], (d_model, d_model), jnp.float32)
    bq = s * jax.random.normal(ks[1], (d_model,), jnp.float32)
    wk = s * jax.random.normal(ks[2], (d_model, d_model), jnp.float32)
    bk = s * jax.random.normal(ks[3], (d_model,), jnp.float32)
    wv = s * jax.random.normal(ks[4], (d_model, d_model), jnp.float32)
    bv = s * jax.random.normal(ks[5], (d_model,), jnp.float32)
    wo = s * jax.random.normal(ks[6], (d_model, d_model), jnp.float32)
    bo = s * jax.random.normal(ks[7], (d_model,), jnp.float32)
    return (wq, bq, wk, bk, wv, bv, wo, bo)


if __name__ == "__main__":
    key = jax.random.PRNGKey(0)
    kq, kk, kv, kp = jax.random.split(key, 4)

    B, S, D, H = 2, 8, 32, 4   # batch=2, seq=8, d_model=32, heads=4 (d_k=8)

    q = jax.random.normal(kq, (B, S, D), jnp.float32)
    k = jax.random.normal(kk, (B, S, D), jnp.float32)
    v = jax.random.normal(kv, (B, S, D), jnp.float32)
    params = make_params(kp, D)

    out = jax.block_until_ready(mha_forward(q, k, v, params, H))
    assert out.shape == (B, S, D), out.shape

    ref = jax.block_until_ready(_reference(q, k, v, params, H))
    err = float(jnp.max(jnp.abs(out - ref)))
    assert jnp.allclose(out, ref, atol=1e-4, rtol=1e-4), err

    print("KERNEL_OK")
</pallas_src>

<mosaic_0001>
module attributes {stable_mosaic.version = 11 : i64} {
  func.func @_mha_kernel(%arg0: i32, %arg1: memref<1x8x32xf32, #tpu.memory_space<vmem>>, %arg2: memref<1x8x32xf32, #tpu.memory_space<vmem>>, %arg3: memref<1x8x32xf32, #tpu.memory_space<vmem>>, %arg4: memref<32x32xf32, #tpu.memory_space<vmem>>, %arg5: memref<32x32xf32, #tpu.memory_space<vmem>>, %arg6: memref<32x32xf32, #tpu.memory_space<vmem>>, %arg7: memref<1x32xf32, #tpu.memory_space<vmem>>, %arg8: memref<1x32xf32, #tpu.memory_space<vmem>>, %arg9: memref<1x32xf32, #tpu.memory_space<vmem>>, %arg10: memref<4x8x32xf32, #tpu.memory_space<vmem>>, %arg11: memref<1x32xf32, #tpu.memory_space<vmem>>, %arg12: memref<1x8x32xf32, #tpu.memory_space<vmem>>) attributes {dimension_semantics = [#tpu.dimension_semantics<parallel>], iteration_bounds = array<i64: 2>, scalar_prefetch = 0 : i64, scratch_operands = 0 : i64, tpu.core_type = #tpu.core_type<tc>, window_params = [{transform_indices = @transform_0, window_bounds = array<i64: 1, 8, 32>}, {transform_indices = @transform_1, window_bounds = array<i64: 1, 8, 32>}, {transform_indices = @transform_2, window_bounds = array<i64: 1, 8, 32>}, {pipeline_mode = #tpu.pipeline_mode<synchronous>, transform_indices = @transform_3, window_bounds = array<i64: 32, 32>}, {pipeline_mode = #tpu.pipeline_mode<synchronous>, transform_indices = @transform_4, window_bounds = array<i64: 32, 32>}, {pipeline_mode = #tpu.pipeline_mode<synchronous>, transform_indices = @transform_5, window_bounds = array<i64: 32, 32>}, {pipeline_mode = #tpu.pipeline_mode<synchronous>, transform_indices = @transform_6, window_bounds = array<i64: 1, 32>}, {pipeline_mode = #tpu.pipeline_mode<synchronous>, transform_indices = @transform_7, window_bounds = array<i64: 1, 32>}, {pipeline_mode = #tpu.pipeline_mode<synchronous>, transform_indices = @transform_8, window_bounds = array<i64: 1, 32>}, {pipeline_mode = #tpu.pipeline_mode<synchronous>, transform_indices = @transform_9, window_bounds = array<i64: 4, 8, 32>}, {pipeline_mode = #tpu.pipeline_mode<synchronous>, transform_indices = @transform_10, window_bounds = array<i64: 1, 32>}, {transform_indices = @transform_11, window_bounds = array<i64: 1, 8, 32>}]} {
    %c0 = arith.constant 0 : index
    %c0_0 = arith.constant 0 : index
    %c0_1 = arith.constant 0 : index
    %0 = vector.load %arg1[%c0, %c0_0, %c0_1] : memref<1x8x32xf32, #tpu.memory_space<vmem>>, vector<1x8x32xf32>
    %1 = vector.shape_cast %0 : vector<1x8x32xf32> to vector<8x32xf32>
    %c0_2 = arith.constant 0 : index
    %c0_3 = arith.constant 0 : index
    %2 = vector.load %arg4[%c0_2, %c0_3] : memref<32x32xf32, #tpu.memory_space<vmem>>, vector<32x32xf32>
    %cst = arith.constant dense<0.000000e+00> : vector<8x32xf32>
    %3 = tpu.matmul %1, %2, %cst {dimension_numbers = #tpu.dot_dimension_numbers<[1], [0], [0], [1], [0, 0, 1, 1], [], []>} : vector<8x32xf32>, vector<32x32xf32>, vector<8x32xf32> -> vector<8x32xf32>
    %c0_4 = arith.constant 0 : index
    %c0_5 = arith.constant 0 : index
    %4 = vector.load %arg7[%c0_4, %c0_5] : memref<1x32xf32, #tpu.memory_space<vmem>>, vector<1x32xf32>
    %5 = vector.broadcast %4 : vector<1x32xf32> to vector<8x32xf32>
    %6 = arith.addf %3, %5 : vector<8x32xf32>
    %c0_6 = arith.constant 0 : index
    %c0_7 = arith.constant 0 : index
    %c0_8 = arith.constant 0 : index
    %7 = vector.load %arg2[%c0_6, %c0_7, %c0_8] : memref<1x8x32xf32, #tpu.memory_space<vmem>>, vector<1x8x32xf32>
    %8 = vector.shape_cast %7 : vector<1x8x32xf32> to vector<8x32xf32>
    %c0_9 = arith.constant 0 : index
    %c0_10 = arith.constant 0 : index
    %9 = vector.load %arg5[%c0_9, %c0_10] : memref<32x32xf32, #tpu.memory_space<vmem>>, vector<32x32xf32>
    %cst_11 = arith.constant dense<0.000000e+00> : vector<8x32xf32>
    %10 = tpu.matmul %8, %9, %cst_11 {dimension_numbers = #tpu.dot_dimension_numbers<[1], [0], [0], [1], [0, 0, 1, 1], [], []>} : vector<8x32xf32>, vector<32x32xf32>, vector<8x32xf32> -> vector<8x32xf32>
    %c0_12 = arith.constant 0 : index
    %c0_13 = arith.constant 0 : index
    %11 = vector.load %arg8[%c0_12, %c0_13] : memref<1x32xf32, #tpu.memory_space<vmem>>, vector<1x32xf32>
    %12 = vector.broadcast %11 : vector<1x32xf32> to vector<8x32xf32>
    %13 = arith.addf %10, %12 : vector<8x32xf32>
    %c0_14 = arith.constant 0 : index
    %c0_15 = arith.constant 0 : index
    %c0_16 = arith.constant 0 : index
    %14 = vector.load %arg3[%c0_14, %c0_15, %c0_16] : memref<1x8x32xf32, #tpu.memory_space<vmem>>, vector<1x8x32xf32>
    %15 = vector.shape_cast %14 : vector<1x8x32xf32> to vector<8x32xf32>
    %c0_17 = arith.constant 0 : index
    %c0_18 = arith.constant 0 : index
    %16 = vector.load %arg6[%c0_17, %c0_18] : memref<32x32xf32, #tpu.memory_space<vmem>>, vector<32x32xf32>
    %cst_19 = arith.constant dense<0.000000e+00> : vector<8x32xf32>
    %17 = tpu.matmul %15, %16, %cst_19 {dimension_numbers = #tpu.dot_dimension_numbers<[1], [0], [0], [1], [0, 0, 1, 1], [], []>} : vector<8x32xf32>, vector<32x32xf32>, vector<8x32xf32> -> vector<8x32xf32>
    %c0_20 = arith.constant 0 : index
    %c0_21 = arith.constant 0 : index
    %18 = vector.load %arg9[%c0_20, %c0_21] : memref<1x32xf32, #tpu.memory_space<vmem>>, vector<1x32xf32>
    %19 = vector.broadcast %18 : vector<1x32xf32> to vector<8x32xf32>
    %20 = arith.addf %17, %19 : vector<8x32xf32>
    %cst_22 = arith.constant 0.000000e+00 : f32
    %21 = vector.broadcast %cst_22 : f32 to vector<8x32xf32>
    %22 = vector.extract_strided_slice %6 {offsets = [0, 0], sizes = [8, 8], strides = [1, 1]} : vector<8x32xf32> to vector<8x8xf32>
    %23 = vector.extract_strided_slice %13 {offsets = [0, 0], sizes = [8, 8], strides = [1, 1]} : vector<8x32xf32> to vector<8x8xf32>
    %24 = vector.extract_strided_slice %20 {offsets = [0, 0], sizes = [8, 8], strides = [1, 1]} : vector<8x32xf32> to vector<8x8xf32>
    %cst_23 = arith.constant dense<0.000000e+00> : vector<8x8xf32>
    %25 = tpu.matmul %22, %23, %cst_23 {dimension_numbers = #tpu.dot_dimension_numbers<[1], [1], [0], [0], [0, 0, 1, 0], [], []>} : vector<8x8xf32>, vector<8x8xf32>, vector<8x8xf32> -> vector<8x8xf32>
    %cst_24 = arith.constant 0.353553385 : f32
    %26 = vector.broadcast %cst_24 : f32 to vector<8x8xf32>
    %27 = arith.mulf %25, %26 : vector<8x8xf32>
    %cst_25 = arith.constant dense<0xFF800000> : vector<8xf32>
    %28 = vector.multi_reduction <maximumf>, %27, %cst_25 [1] : vector<8x8xf32> to vector<8xf32>
    %29 = vector.shape_cast %28 : vector<8xf32> to vector<8x1xf32>
    %30 = vector.broadcast %29 : vector<8x1xf32> to vector<8x8xf32>
    %31 = arith.subf %27, %30 : vector<8x8xf32>
    %32 = math.exp %31 : vector<8x8xf32>
    %cst_26 = arith.constant dense<0.000000e+00> : vector<8xf32>
    %33 = vector.multi_reduction <add>, %32, %cst_26 [1] : vector<8x8xf32> to vector<8xf32>
    %34 = vector.shape_cast %33 : vector<8xf32> to vector<8x1xf32>
    %35 = vector.broadcast %34 : vector<8x1xf32> to vector<8x8xf32>
    %36 = arith.divf %32, %35 : vector<8x8xf32>
    %cst_27 = arith.constant dense<0.000000e+00> : vector<8x8xf32>
    %37 = tpu.matmul %36, %24, %cst_27 {dimension_numbers = #tpu.dot_dimension_numbers<[1], [0], [0], [1], [0, 0, 1, 1], [], []>} : vector<8x8xf32>, vector<8x8xf32>, vector<8x8xf32> -> vector<8x8xf32>
    %c0_28 = arith.constant 0 : index
    %c0_29 = arith.constant 0 : index
    %c0_30 = arith.constant 0 : index
    %38 = vector.load %arg10[%c0_28, %c0_29, %c0_30] : memref<4x8x32xf32, #tpu.memory_space<vmem>>, vector<1x8x32xf32>
    %39 = vector.shape_cast %38 : vector<1x8x32xf32> to vector<8x32xf32>
    %cst_31 = arith.constant dense<0.000000e+00> : vector<8x32xf32>
    %40 = tpu.matmul %37, %39, %cst_31 {dimension_numbers = #tpu.dot_dimension_numbers<[1], [0], [0], [1], [0, 0, 1, 1], [], []>} : vector<8x8xf32>, vector<8x32xf32>, vector<8x32xf32> -> vector<8x32xf32>
    %41 = arith.addf %21, %40 : vector<8x32xf32>
    %42 = vector.extract_strided_slice %6 {offsets = [0, 8], sizes = [8, 8], strides = [1, 1]} : vector<8x32xf32> to vector<8x8xf32>
    %43 = vector.extract_strided_slice %13 {offsets = [0, 8], sizes = [8, 8], strides = [1, 1]} : vector<8x32xf32> to vector<8x8xf32>
    %44 = vector.extract_strided_slice %20 {offsets = [0, 8], sizes = [8, 8], strides = [1, 1]} : vector<8x32xf32> to vector<8x8xf32>
    %cst_32 = arith.constant dense<0.000000e+00> : vector<8x8xf32>
    %45 = tpu.matmul %42, %43, %cst_32 {dimension_numbers = #tpu.dot_dimension_numbers<[1], [1], [0], [0], [0, 0, 1, 0], [], []>} : vector<8x8xf32>, vector<8x8xf32>, vector<8x8xf32> -> vector<8x8xf32>
    %cst_33 = arith.constant 0.353553385 : f32
    %46 = vector.broadcast %cst_33 : f32 to vector<8x8xf32>
    %47 = arith.mulf %45, %46 : vector<8x8xf32>
    %cst_34 = arith.constant dense<0xFF800000> : vector<8xf32>
    %48 = vector.multi_reduction <maximumf>, %47, %cst_34 [1] : vector<8x8xf32> to vector<8xf32>
    %49 = vector.shape_cast %48 : vector<8xf32> to vector<8x1xf32>
    %50 = vector.broadcast %49 : vector<8x1xf32> to vector<8x8xf32>
    %51 = arith.subf %47, %50 : vector<8x8xf32>
    %52 = math.exp %51 : vector<8x8xf32>
    %cst_35 = arith.constant dense<0.000000e+00> : vector<8xf32>
    %53 = vector.multi_reduction <add>, %52, %cst_35 [1] : vector<8x8xf32> to vector<8xf32>
    %54 = vector.shape_cast %53 : vector<8xf32> to vector<8x1xf32>
    %55 = vector.broadcast %54 : vector<8x1xf32> to vector<8x8xf32>
    %56 = arith.divf %52, %55 : vector<8x8xf32>
    %cst_36 = arith.constant dense<0.000000e+00> : vector<8x8xf32>
    %57 = tpu.matmul %56, %44, %cst_36 {dimension_numbers = #tpu.dot_dimension_numbers<[1], [0], [0], [1], [0, 0, 1, 1], [], []>} : vector<8x8xf32>, vector<8x8xf32>, vector<8x8xf32> -> vector<8x8xf32>
    %c1 = arith.constant 1 : index
    %c0_37 = arith.constant 0 : index
    %c0_38 = arith.constant 0 : index
    %58 = vector.load %arg10[%c1, %c0_37, %c0_38] : memref<4x8x32xf32, #tpu.memory_space<vmem>>, vector<1x8x32xf32>
    %59 = vector.shape_cast %58 : vector<1x8x32xf32> to vector<8x32xf32>
    %cst_39 = arith.constant dense<0.000000e+00> : vector<8x32xf32>
    %60 = tpu.matmul %57, %59, %cst_39 {dimension_numbers = #tpu.dot_dimension_numbers<[1], [0], [0], [1], [0, 0, 1, 1], [], []>} : vector<8x8xf32>, vector<8x32xf32>, vector<8x32xf32> -> vector<8x32xf32>
    %61 = arith.addf %41, %60 : vector<8x32xf32>
    %62 = vector.extract_strided_slice %6 {offsets = [0, 16], sizes = [8, 8], strides = [1, 1]} : vector<8x32xf32> to vector<8x8xf32>
    %63 = vector.extract_strided_slice %13 {offsets = [0, 16], sizes = [8, 8], strides = [1, 1]} : vector<8x32xf32> to vector<8x8xf32>
    %64 = vector.extract_strided_slice %20 {offsets = [0, 16], sizes = [8, 8], strides = [1, 1]} : vector<8x32xf32> to vector<8x8xf32>
    %cst_40 = arith.constant dense<0.000000e+00> : vector<8x8xf32>
    %65 = tpu.matmul %62, %63, %cst_40 {dimension_numbers = #tpu.dot_dimension_numbers<[1], [1], [0], [0], [0, 0, 1, 0], [], []>} : vector<8x8xf32>, vector<8x8xf32>, vector<8x8xf32> -> vector<8x8xf32>
    %cst_41 = arith.constant 0.353553385 : f32
    %66 = vector.broadcast %cst_41 : f32 to vector<8x8xf32>
    %67 = arith.mulf %65, %66 : vector<8x8xf32>
    %cst_42 = arith.constant dense<0xFF800000> : vector<8xf32>
    %68 = vector.multi_reduction <maximumf>, %67, %cst_42 [1] : vector<8x8xf32> to vector<8xf32>
    %69 = vector.shape_cast %68 : vector<8xf32> to vector<8x1xf32>
    %70 = vector.broadcast %69 : vector<8x1xf32> to vector<8x8xf32>
    %71 = arith.subf %67, %70 : vector<8x8xf32>
    %72 = math.exp %71 : vector<8x8xf32>
    %cst_43 = arith.constant dense<0.000000e+00> : vector<8xf32>
    %73 = vector.multi_reduction <add>, %72, %cst_43 [1] : vector<8x8xf32> to vector<8xf32>
    %74 = vector.shape_cast %73 : vector<8xf32> to vector<8x1xf32>
    %75 = vector.broadcast %74 : vector<8x1xf32> to vector<8x8xf32>
    %76 = arith.divf %72, %75 : vector<8x8xf32>
    %cst_44 = arith.constant dense<0.000000e+00> : vector<8x8xf32>
    %77 = tpu.matmul %76, %64, %cst_44 {dimension_numbers = #tpu.dot_dimension_numbers<[1], [0], [0], [1], [0, 0, 1, 1], [], []>} : vector<8x8xf32>, vector<8x8xf32>, vector<8x8xf32> -> vector<8x8xf32>
    %c2 = arith.constant 2 : index
    %c0_45 = arith.constant 0 : index
    %c0_46 = arith.constant 0 : index
    %78 = vector.load %arg10[%c2, %c0_45, %c0_46] : memref<4x8x32xf32, #tpu.memory_space<vmem>>, vector<1x8x32xf32>
    %79 = vector.shape_cast %78 : vector<1x8x32xf32> to vector<8x32xf32>
    %cst_47 = arith.constant dense<0.000000e+00> : vector<8x32xf32>
    %80 = tpu.matmul %77, %79, %cst_47 {dimension_numbers = #tpu.dot_dimension_numbers<[1], [0], [0], [1], [0, 0, 1, 1], [], []>} : vector<8x8xf32>, vector<8x32xf32>, vector<8x32xf32> -> vector<8x32xf32>
    %81 = arith.addf %61, %80 : vector<8x32xf32>
    %82 = vector.extract_strided_slice %6 {offsets = [0, 24], sizes = [8, 8], strides = [1, 1]} : vector<8x32xf32> to vector<8x8xf32>
    %83 = vector.extract_strided_slice %13 {offsets = [0, 24], sizes = [8, 8], strides = [1, 1]} : vector<8x32xf32> to vector<8x8xf32>
    %84 = vector.extract_strided_slice %20 {offsets = [0, 24], sizes = [8, 8], strides = [1, 1]} : vector<8x32xf32> to vector<8x8xf32>
    %cst_48 = arith.constant dense<0.000000e+00> : vector<8x8xf32>
    %85 = tpu.matmul %82, %83, %cst_48 {dimension_numbers = #tpu.dot_dimension_numbers<[1], [1], [0], [0], [0, 0, 1, 0], [], []>} : vector<8x8xf32>, vector<8x8xf32>, vector<8x8xf32> -> vector<8x8xf32>
    %cst_49 = arith.constant 0.353553385 : f32
    %86 = vector.broadcast %cst_49 : f32 to vector<8x8xf32>
    %87 = arith.mulf %85, %86 : vector<8x8xf32>
    %cst_50 = arith.constant dense<0xFF800000> : vector<8xf32>
    %88 = vector.multi_reduction <maximumf>, %87, %cst_50 [1] : vector<8x8xf32> to vector<8xf32>
    %89 = vector.shape_cast %88 : vector<8xf32> to vector<8x1xf32>
    %90 = vector.broadcast %89 : vector<8x1xf32> to vector<8x8xf32>
    %91 = arith.subf %87, %90 : vector<8x8xf32>
    %92 = math.exp %91 : vector<8x8xf32>
    %cst_51 = arith.constant dense<0.000000e+00> : vector<8xf32>
    %93 = vector.multi_reduction <add>, %92, %cst_51 [1] : vector<8x8xf32> to vector<8xf32>
    %94 = vector.shape_cast %93 : vector<8xf32> to vector<8x1xf32>
    %95 = vector.broadcast %94 : vector<8x1xf32> to vector<8x8xf32>
    %96 = arith.divf %92, %95 : vector<8x8xf32>
    %cst_52 = arith.constant dense<0.000000e+00> : vector<8x8xf32>
    %97 = tpu.matmul %96, %84, %cst_52 {dimension_numbers = #tpu.dot_dimension_numbers<[1], [0], [0], [1], [0, 0, 1, 1], [], []>} : vector<8x8xf32>, vector<8x8xf32>, vector<8x8xf32> -> vector<8x8xf32>
    %c3 = arith.constant 3 : index
    %c0_53 = arith.constant 0 : index
    %c0_54 = arith.constant 0 : index
    %98 = vector.load %arg10[%c3, %c0_53, %c0_54] : memref<4x8x32xf32, #tpu.memory_space<vmem>>, vector<1x8x32xf32>
    %99 = vector.shape_cast %98 : vector<1x8x32xf32> to vector<8x32xf32>
    %cst_55 = arith.constant dense<0.000000e+00> : vector<8x32xf32>
    %100 = tpu.matmul %97, %99, %cst_55 {dimension_numbers = #tpu.dot_dimension_numbers<[1], [0], [0], [1], [0, 0, 1, 1], [], []>} : vector<8x8xf32>, vector<8x32xf32>, vector<8x32xf32> -> vector<8x32xf32>
    %101 = arith.addf %81, %100 : vector<8x32xf32>
    %c0_56 = arith.constant 0 : index
    %c0_57 = arith.constant 0 : index
    %102 = vector.load %arg11[%c0_56, %c0_57] : memref<1x32xf32, #tpu.memory_space<vmem>>, vector<1x32xf32>
    %103 = vector.broadcast %102 : vector<1x32xf32> to vector<8x32xf32>
    %104 = arith.addf %101, %103 : vector<8x32xf32>
    %c0_58 = arith.constant 0 : index
    %c0_59 = arith.constant 0 : index
    %c0_60 = arith.constant 0 : index
    %105 = vector.load %arg12[%c0_58, %c0_59, %c0_60] : memref<1x8x32xf32, #tpu.memory_space<vmem>>, vector<1x8x32xf32>
    %106 = vector.shape_cast %105 : vector<1x8x32xf32> to vector<8x32xf32>
    %107 = vector.shape_cast %104 : vector<8x32xf32> to vector<1x8x32xf32>
    tpu.vector_store %arg12[%c0_58, %c0_59, %c0_60], %107 {strides = array<i32>} : memref<1x8x32xf32, #tpu.memory_space<vmem>>, vector<1x8x32xf32>,
    return
  }
  func.func @transform_0(%arg0: i32) -> (i32, i32, i32) {
    %c0_i32 = arith.constant 0 : i32
    %c0_i32_0 = arith.constant 0 : i32
    %c0_i32_1 = arith.constant 0 : i32
    return %arg0, %c0_i32, %c0_i32_0 : i32, i32, i32
  }
  func.func @transform_1(%arg0: i32) -> (i32, i32, i32) {
    %c0_i32 = arith.constant 0 : i32
    %c0_i32_0 = arith.constant 0 : i32
    %c0_i32_1 = arith.constant 0 : i32
    return %arg0, %c0_i32, %c0_i32_0 : i32, i32, i32
  }
  func.func @transform_2(%arg0: i32) -> (i32, i32, i32) {
    %c0_i32 = arith.constant 0 : i32
    %c0_i32_0 = arith.constant 0 : i32
    %c0_i32_1 = arith.constant 0 : i32
    return %arg0, %c0_i32, %c0_i32_0 : i32, i32, i32
  }
  func.func @transform_3(%arg0: i32) -> (i32, i32) {
    %c0_i32 = arith.constant 0 : i32
    %c0_i32_0 = arith.constant 0 : i32
    %c0_i32_1 = arith.constant 0 : i32
    return %c0_i32, %c0_i32_0 : i32, i32
  }
  func.func @transform_4(%arg0: i32) -> (i32, i32) {
    %c0_i32 = arith.constant 0 : i32
    %c0_i32_0 = arith.constant 0 : i32
    %c0_i32_1 = arith.constant 0 : i32
    return %c0_i32, %c0_i32_0 : i32, i32
  }
  func.func @transform_5(%arg0: i32) -> (i32, i32) {
    %c0_i32 = arith.constant 0 : i32
    %c0_i32_0 = arith.constant 0 : i32
    %c0_i32_1 = arith.constant 0 : i32
    return %c0_i32, %c0_i32_0 : i32, i32
  }
  func.func @transform_6(%arg0: i32) -> (i32, i32) {
    %c0_i32 = arith.constant 0 : i32
    %c0_i32_0 = arith.constant 0 : i32
    %c0_i32_1 = arith.constant 0 : i32
    return %c0_i32, %c0_i32_0 : i32, i32
  }
  func.func @transform_7(%arg0: i32) -> (i32, i32) {
    %c0_i32 = arith.constant 0 : i32
    %c0_i32_0 = arith.constant 0 : i32
    %c0_i32_1 = arith.constant 0 : i32
    return %c0_i32, %c0_i32_0 : i32, i32
  }
  func.func @transform_8(%arg0: i32) -> (i32, i32) {
    %c0_i32 = arith.constant 0 : i32
    %c0_i32_0 = arith.constant 0 : i32
    %c0_i32_1 = arith.constant 0 : i32
    return %c0_i32, %c0_i32_0 : i32, i32
  }
  func.func @transform_9(%arg0: i32) -> (i32, i32, i32) {
    %c0_i32 = arith.constant 0 : i32
    %c0_i32_0 = arith.constant 0 : i32
    %c0_i32_1 = arith.constant 0 : i32
    %c0_i32_2 = arith.constant 0 : i32
    return %c0_i32, %c0_i32_0, %c0_i32_1 : i32, i32, i32
  }
  func.func @transform_10(%arg0: i32) -> (i32, i32) {
    %c0_i32 = arith.constant 0 : i32
    %c0_i32_0 = arith.constant 0 : i32
    %c0_i32_1 = arith.constant 0 : i32
    return %c0_i32, %c0_i32_0 : i32, i32
  }
  func.func @transform_11(%arg0: i32) -> (i32, i32, i32) {
    %c0_i32 = arith.constant 0 : i32
    %c0_i32_0 = arith.constant 0 : i32
    %c0_i32_1 = arith.constant 0 : i32
    return %arg0, %c0_i32, %c0_i32_0 : i32, i32, i32
  }
}

</mosaic_0001>

<bundles_post_ra>
// kernel: tpu_custom_call.1
= control target key start
LH: loop header
LB: loop body
LE: loop exit
PB: predicated region body
PF: predicated region fallthrough
CT: control target
= control target key end

     0   :  { %s2057_s0 = inlined_call_operand.hbm [shape: f32[2,8,32], index: 0, kind: input, shape index: {}]   ;;  %s2058_s1 = inlined_call_operand.hbm [shape: f32[2,8,32], index: 1, kind: input, shape index: {}]   ;;  %s2059_s2 = inlined_call_operand.hbm [shape: f32[2,8,32], index: 2, kind: input, shape index: {}]   ;;  %s2060_s3 = inlined_call_operand.hbm [shape: f32[32,32], index: 3, kind: input, shape index: {}]   ;;  %s2061_s4 = inlined_call_operand.hbm [shape: f32[32,32], index: 4, kind: input, shape index: {}]   ;;  %s2062_s5 = inlined_call_operand.hbm [shape: f32[32,32], index: 5, kind: input, shape index: {}]   ;;  %s2063_s6 = inlined_call_operand.vmem [shape: f32[1,32], index: 6, kind: input, shape index: {}]   ;;  %s2064_s7 = inlined_call_operand.vmem [shape: f32[1,32], index: 7, kind: input, shape index: {}]   ;;  %s2065_s8 = inlined_call_operand.vmem [shape: f32[1,32], index: 8, kind: input, shape index: {}]   ;;  %s2066_s9 = inlined_call_operand.hbm [shape: f32[4,8,32], index: 9, kind: input, shape index: {}]   ;;  %s2067_s10 = inlined_call_operand.vmem [shape: f32[1,32], index: 10, kind: input, shape index: {}]   ;;  %s2068_s11 = inlined_call_operand.hbm [shape: f32[2,8,32], index: 11, kind: output, shape index: {}]  }
   0x1   :  { %2082 = sst [smem:[#allocation26_spill]] %s2058_s1 }
   0x2   :  { %2083 = sst [smem:[#allocation27_spill]] %s2060_s3 }
   0x3   :  { %2084 = sst [smem:[#allocation28_spill]] %s2061_s4 }
   0x4   :  { %2085 = sst [smem:[#allocation29_spill]] %s2062_s5 }
   0x5   :  { %2086 = sst [smem:[#allocation30_spill]] %s2066_s9 }
   0x6   :  { %16 = vsyncpa [#allocation3], 0 }
   0x7   :  { %18 = vsyncpa [#allocation3 + $0x1], 0 }
   0x8   :  { %19 = vsyncpa [#allocation6], 0 }
   0x9   :  { %21 = vsyncpa [#allocation6 + $0x1], 0 }
   0xa   :  { %22 = vsyncpa [#allocation9], 0 }
   0xb   :  { %23 = vsyncpa [#allocation12], 0 }
   0xc   :  { %24 = vsyncpa [#allocation4], 0 }
   0xd   :  { %26 = vsyncpa [#allocation4 + $0x1], 0  ;;  %s1755_s17 = smov 0   ;;  %s1757_s18 = smov 0  }
   0xe   :  { %s1759_s19 = smov 0   ;;  %s1761_s20 = smov 0  }
   0xf LB: > { %2087 = sst [smem:[#allocation20_spill]] %s1672_s17  ;;  %s1779_s24 = sadd.s32 4294967295, %s1684_s20   ;;  %s1684_s20 = sphi %s1761_s20, %s2116_s20   ;;  %s1680_s19 = sphi %s1759_s19, %s2120_s19   ;;  %s1676_s18 = sphi %s1757_s18, %s2119_s18   ;;  %s1672_s17 = sphi %s1755_s17, %s2118_s17  }
  0x10   : > { %2088 = sst [smem:[#allocation21_spill]] %s1684_s20  ;;  %p1230_p0 = scmp.ge.s32.totalorder %s1684_s20, 1 }
  0x11   : > { %s2089_s3 = sld [smem:[#allocation27_spill]]  ;;  %p2079_p1 = scmp.eq.s32.totalorder %s1779_s24, 0 }
  0x12   : > { %p309_p2 = scmp.lt.s32.totalorder %s1684_s20, 3  ;;  %s1686_s26 = smov [#allocation8]  }
  0x13   : > { %s322_s27 = sshll.u32 %s1686_s26, 4  ;;  %s2091_s5 = sld [smem:[#allocation29_spill]]  ;;  %s323_s27 = int_to_ptr.vmem [resolvable:$true] %s322_s27 }
  0x14   : > { %p1784_p3 = pnand %p1230_p0, %p309_p2  ;;  %s1687_s13 = smov [#allocation11]  }
  0x15   : > { %s350_s14 = sshll.u32 %s1687_s13, 4  ;;  %s2069_s15 = smov 128   ;;  %s351_s14 = int_to_ptr.vmem [resolvable:$true] %s350_s14 }
  0x16   : > { %p1298_p4 = pneg %p1784_p3  ;;  %s2071_s16 = smov 8  }
  0x17   : > { %s320_s23 = sshll.u32 %s2089_s3, 4  ;;  %s1229_s21 = sadd.s32 4294967294, %s1684_s20   ;;  %s321_s23 = int_to_ptr.hbm [resolvable:$true] %s320_s23 }
  0x18   : > { %p1796_p6 = pnand %p1298_p4, %p2079_p1  ;;  %s1812_s22 = sadd.s32 1, %s1684_s20  }
  0x19   : > { %s348_s30 = sshll.u32 %s2091_s5, 4  ;;  %2093 = sst [smem:[#allocation22_spill]] %s1812_s22  ;;  %s349_s30 = int_to_ptr.hbm [resolvable:$true] %s348_s30 }
  0x1a   : > { %1301 = dma.hbm_to_vmem [thread:$0]  (!%p1796_p6), %s321_s23, 512, %s323_s27, [#allocation9], %s2069_s15, %s2069_s15, %s2071_s16  }
  0x1b   : > { %1307 = dma.hbm_to_vmem [thread:$0]  (!%p1796_p6), %s349_s30, 512, %s351_s14, [#allocation12], %s2069_s15, %s2069_s15, %s2071_s16  }
  0x1c   : > { %s36_s26 = ssub.s32 %s1684_s20, %s1812_s22  ;;  %s39_s28 = sadd.s32 1, %s1680_s19 }
  0x1d   : > { %p37_p7 = scmp.eq.s32.totalorder %s36_s26, 0  ;;  %p46_p8 = scmp.ne.s32.totalorder %s1680_s19, %s1676_s18 }
  0x1e   : > { %p47_p9 = scmp.eq.s32.totalorder %s1684_s20, 0  ;;  %p52_p10 = scmp.ne.s32.totalorder %s1676_s18, %s1672_s17 }
  0x1f   : > { %s1823_s23 = scalar_select %p37_p7, %s1680_s19, %s39_s28  }
  0x20   : > { %p48_p11 = por %p47_p9, %p46_p8  ;;  %p1827_p12 = por %p2079_p1, %p52_p10 }
  0x21   : > { %2094 = sst [smem:[#allocation23_spill]] %s1823_s23  ;;  %p296_p13 = scmp.eq.s32.totalorder %s1779_s24, 1 }
  0x22   : > { %p302_p0 = scmp.eq.s32.totalorder %s1229_s21, 1  ;;  %p1329_p2 = scmp.lt.s32.totalorder %s1684_s20, 2 }
  0x23   : > { %s2075_s29 = sand.u32 1, %s1680_s19   ;;  %p1834_p4 = por %p296_p13, %p46_p8 }
  0x24   : > { %p1838_p5 = por %p302_p0, %p52_p10  ;;  %s1844_s14 = sshll.u32 %s2075_s29, 3 }
  0x25   : > { %s2096_s30 = scalar_select %p1834_p4, 1, 0 }
  0x26   : > { %s2098_s13 = scalar_select %p1838_p5, 1, 0 }
  0x27   : > { %2097 = sst [smem:[#allocation24_spill]] %s2096_s30  ;;  %s1847_s26 = sshll.u32 %s1684_s20, 3 }
  0x28   : > { %2099 = sst [smem:[#allocation25_spill]] %s2098_s13  ;;  %p1849_p7 = pnand %p1329_p2, %p48_p11 }
  0x29   : > { %s409_s21 = sand.u32 1, %s1684_s20   ;;  %s2101_s1 = sld [smem:[#allocation26_spill]] }
  0x2a   : > { %s413_s23 = scalar_lea.vmem [#allocation5], %s1844_s14  ;;  %s1859_s29 = scalar_lea.sflag [#allocation6], %s409_s21 }
  0x2b   : > { %s421_s22 = sshll.u32 %s413_s23, 4  ;;  %p1460_p9 = pneg %p1849_p7  ;;  %s422_s22 = int_to_ptr.vmem [resolvable:$true] %s421_s22 }
  0x2f   : > { %s417_s3 = scalar_lea.hbm %s2101_s1, %s1847_s26 }
  0x30   : > { %s419_s5 = sshll.u32 %s417_s3, 4  ;;  %s1463_s3 = scalar_lea.hbm %s2101_s1, 16  ;;  %s420_s5 = int_to_ptr.hbm [resolvable:$true] %s419_s5 }
  0x31   : > { %s1456_s13 = sshra.s32 %s420_s5, 4  ;;  %s1457_s13 = int_to_ptr.hbm [resolvable:$true] %s1456_s13 }
  0x32   : > { %s1458_s17 = scalar_lea.hbm %s1457_s13, 8  ;;  %p1464_p13 = scmp.lt.s32.totalorder %s1457_s13, %s2101_s1 }
  0x33   : > { %p1459_p8 = scmp.ne.s32.totalorder %s1457_s13, %s1458_s17  ;;  %p1465_p0 = scmp.lt.s32.totalorder %s1463_s3, %s1458_s17 }
  0x35   : > { %p1461_p10 = pnand %p1460_p9, %p1459_p8  ;;  %p1466_p2 = por %p1465_p0, %p1464_p13 }
  0x37   : > { %p1462_p11 = pneg %p1461_p10 }
  0x39   : > { %p1467_p1 = pnand %p1466_p2, %p1462_p11 }
  0x3b   : > { %1470 = shalt.err (!%p1467_p1)
}
  0x3c   : > { %1317 = dma.hbm_to_vmem [thread:$0]  (!%p1849_p7), %s420_s5, 128, %s422_s22, %s1859_s29  }
  0x3d   : > { %s2102_s4 = sld [smem:[#allocation28_spill]]  ;;  %s1690_s15 = smov [#allocation10]  }
  0x3e   : > { %s336_s13 = sshll.u32 %s1690_s15, 4  ;;  %s2103_s9 = sld [smem:[#allocation30_spill]]  ;;  %s337_s13 = int_to_ptr.vmem [resolvable:$true] %s336_s13 }
  0x3f   : > { %s2104_s23 = smov 8   ;;  %s2105_s1 = smov 128  }
  0x40   : > { %s1691_s5 = smov [#allocation13]   ;;  %s398_s15 = scalar_lea.hbm %s2057_s0, %s1847_s26 }
  0x41   : > { %s373_s22 = sshll.u32 %s1691_s5, 4  ;;  %s394_s17 = scalar_lea.vmem [#allocation2], %s1844_s14  ;;  %s374_s22 = int_to_ptr.vmem [resolvable:$true] %s373_s22 }
  0x42   : > { %s402_s3 = sshll.u32 %s394_s17, 4  ;;  %s403_s3 = int_to_ptr.vmem [resolvable:$true] %s402_s3 }
  0x43   : > { %s334_s20 = sshll.u32 %s2102_s4, 4  ;;  %s400_s4 = sshll.u32 %s398_s15, 4  ;;  %s335_s20 = int_to_ptr.hbm [resolvable:$true] %s334_s20  ;;  %s401_s4 = int_to_ptr.hbm [resolvable:$true] %s400_s4 }
  0x44   : > { %s371_s16 = sshll.u32 %s2103_s9, 4  ;;  %s1546_s9 = sshra.s32 %s401_s4, 4  ;;  %s372_s16 = int_to_ptr.hbm [resolvable:$true] %s371_s16  ;;  %s1547_s9 = int_to_ptr.hbm [resolvable:$true] %s1546_s9 }
  0x45   : > { %1304 = dma.hbm_to_vmem [thread:$0]  (!%p1796_p6), %s335_s20, 512, %s337_s13, [#allocation9], %s2105_s1, %s2105_s1, %s2104_s23  }
  0x46   : > { %1310 = dma.hbm_to_vmem [thread:$0]  (!%p1796_p6), %s372_s16, 512, %s374_s22, [#allocation12], %s2105_s1, %s2105_s1, %s2104_s23  }
  0x47   : > { %s2106_s20 = sand.u32 1, %s1680_s19   ;;  %s1548_s5 = scalar_lea.hbm %s1547_s9, 8 }
  0x48   : > { %s391_s13 = scalar_lea.sflag [#allocation3], %s2106_s20  ;;  %p1549_p1 = scmp.ne.s32.totalorder %s1547_s9, %s1548_s5 }
  0x49   : > { %s1553_s16 = scalar_lea.hbm %s2057_s0, 16  ;;  %p1554_p6 = scmp.lt.s32.totalorder %s1547_s9, %s2057_s0 }
  0x4a   : > { %p1551_p8 = pnand %p1549_p1, %p1460_p9  ;;  %p1555_p11 = scmp.lt.s32.totalorder %s1553_s16, %s1548_s5 }
  0x4c   : > { %p1552_p10 = pneg %p1551_p8  ;;  %p1556_p13 = por %p1555_p11, %p1554_p6 }
  0x4e   : > { %p1557_p0 = pnand %p1556_p13, %p1552_p10 }
  0x50   : > { %1560 = shalt.err (!%p1557_p0)
}
  0x51   : > { %1314 = dma.hbm_to_vmem [thread:$0]  (!%p1849_p7), %s401_s4, 128, %s403_s3, %s391_s13  }
  0x52   : > { %s436_s15 = scalar_lea.hbm %s2059_s2, %s1847_s26  ;;  %s432_s17 = scalar_lea.vmem [#allocation7], %s1844_s14 }
  0x53   : > { %s440_s20 = sshll.u32 %s432_s17, 4  ;;  %s438_s1 = sshll.u32 %s436_s15, 4  ;;  %s441_s20 = int_to_ptr.vmem [resolvable:$true] %s440_s20  ;;  %s439_s1 = int_to_ptr.hbm [resolvable:$true] %s438_s1 }
  0x54   : > { %s1576_s9 = sshra.s32 %s439_s1, 4  ;;  %s1583_s4 = scalar_lea.hbm %s2059_s2, 16  ;;  %s1577_s9 = int_to_ptr.hbm [resolvable:$true] %s1576_s9 }
  0x55   : > { %s1578_s5 = scalar_lea.hbm %s1577_s9, 8  ;;  %p1584_p10 = scmp.lt.s32.totalorder %s1577_s9, %s2059_s2 }
  0x56   : > { %p1579_p2 = scmp.ne.s32.totalorder %s1577_s9, %s1578_s5  ;;  %p1585_p6 = scmp.lt.s32.totalorder %s1583_s4, %s1578_s5 }
  0x58   : > { %p1581_p1 = pnand %p1579_p2, %p1460_p9  ;;  %p1586_p11 = por %p1585_p6, %p1584_p10 }
  0x5a   : > { %p1582_p8 = pneg %p1581_p1 }
  0x5c   : > { %p1587_p13 = pnand %p1586_p11, %p1582_p8 }
  0x5e   : > { %1590 = shalt.err (!%p1587_p13)
}
  0x5f   : > { %1320 = dma.hbm_to_vmem [thread:$0]  (!%p1849_p7), %s439_s1, 128, %s441_s20, %s1859_s29  }
  0x60   : > { %449 = sbr.rel (%p1784_p3) target bundleno = 1460 (0x5b4), region = 64  ;;  %s1929_s14 = sand.u32 (!%p1784_p3), 1, %s1676_s18  }
  0x61   : > { %s1932_s26 = sshll.u32 (!%p1784_p3), %s1929_s14, 3  ;;  %s452_s23 = scalar_lea.sflag (!%p1784_p3), [#allocation3], %s1929_s14 }
  0x62   : > { %s455_s22 = scalar_lea.vmem (!%p1784_p3), [#allocation2], %s1932_s26 }
  0x65   : > { %1651 = dma.done.wait (%p1827_p12), %s452_s23, 128  }
  0x66   : > { %1653 = vsyncadd (%p1827_p12), %s452_s23, 4294967168  ;;  %s461_s25 = sand.u32 1, %s1779_s24   ;;  %s465_s28 = scalar_lea.vmem [#allocation5], %s1932_s26 }
  0x67   : > { %s462_s29 = scalar_lea.sflag [#allocation6], %s461_s25 }
  0x68   : > { %1655 = dma.done.wait (%p1827_p12), %s462_s29, 256  }
  0x69   : > { %1657 = vsyncadd (%p1827_p12), %s462_s29, 4294967040  ;;  %s475_s30 = scalar_lea.vmem [#allocation7], %s1932_s26  ;;  %p2107_p3 = scmp.eq.s32.totalorder %s1779_s24, 0 }
  0x6b   : > { %1659 = dma.done.wait (%p2107_p3), [#allocation9], 1024   ;;  %p2108_p7 = pmov %p2107_p3 }
  0x6c   : > { %p2109_p9 = pmov %p2107_p3 }
  0x6d   : > { %1661 = vsyncadd (%p2108_p7), [#allocation9], 4294966272 }
  0x6e   : > { %1663 = dma.done.wait (%p2109_p9), [#allocation12], 1024   ;;  %p2110_p0 = pmov %p2107_p3 }
  0x6f   : > { %v582_v0 = vld [vmem:[#allocation10 + $0x18] sm:$0xff]  ;;  %v581_v1 = vld [vmem:[#allocation10 + $0x10] sm:$0xff]  ;;  %v580_v4 = vld [vmem:[#allocation10 + $0x8] sm:$0xff]  ;;  %vm554_vm0 = vcmask 261120   ;;  %vm642_vm1 = vcmask 64512   ;;  %s1692_s20 = smov 112  }
  0x70   : > { %1665 = vsyncadd (%p2110_p0), [#allocation12], 4294966272  ;;  %v549_v2 = vld [vmem:[#allocation8 + $0x18] sm:$0xff]  ;;  %602 = vmatpush.msra.mxu1 %v582_v0  ;;  %v548_v3 = vld [vmem:[#allocation8 + $0x10] sm:$0xff]  ;;  %s1693_s1 = smov 120   ;;  %s1694_s9 = smov 104  }
  0x71   : > { %570 = vmatpush.msra.mxu0 %v549_v2  ;;  %v547_v5 = vld [vmem:[#allocation8 + $0x8] sm:$0xff]  ;;  %v579_v6 = vld [vmem:[#allocation10] sm:$0xff]  ;;  %v545_v9 = vld [vmem:[%s455_s22] sm:$0xff]  ;;  %s1271_s16 = sshll.u32 %s1779_s24, 3  ;;  %s544_s29 = scalar_lea.vmem [#allocation14], %s1932_s26 }
  0x72   : > { %603 = vmatpush.msra.mxu1 %v581_v1  ;;  %v546_v7 = vld [vmem:[#allocation8] sm:$0xff]  ;;  %v1376_v10 = vld [vmem:[%s2064_s7] ss:$0 sm:$0xff]  ;;  %v614_v22 = vld [vmem:[#allocation11 + $0x18] sm:$0xff]  ;;  %s1073_s13 = scalar_lea.hbm %s2068_s11, %s1271_s16  ;;  %s1063_s24 = scalar_lea.sflag [#allocation4], %s1929_s14 }
  0x73   : > { %571 = vmatpush.msra.mxu0 %v548_v3  ;;  %v578_v8 = vld [vmem:[%s465_s28] sm:$0xff]  ;;  %v1377_v11 = vld [vmem:[%s2063_s6] ss:$0 sm:$0xff]  ;;  %634 = vmatpush.msra.mxu2 %v614_v22  ;;  %s1075_s28 = sshll.u32 %s544_s29, 4  ;;  %s1626_s26 = scalar_lea.hbm %s2068_s11, 16  ;;  %s1076_s28 = int_to_ptr.vmem [resolvable:$true] %s1075_s28 }
  0x74   : > { %604 = vmatpush.msra.mxu1 %v580_v4  ;;  %v613_v23 = vld [vmem:[#allocation11 + $0x10] sm:$0xff]  ;;  %v612_v24 = vld [vmem:[#allocation11 + $0x8] sm:$0xff]  ;;  %v611_v25 = vld [vmem:[#allocation11] sm:$0xff] }
  0x75   : > { %572 = vmatpush.msra.mxu0 %v547_v5  ;;  %635 = vmatpush.msra.mxu2 %v613_v23  ;;  %v610_v26 = vld [vmem:[%s475_s30] sm:$0xff]  ;;  %v717_v39 = vld [vmem:[#allocation13] sm:$0xff]  ;;  %s1077_s30 = sshll.u32 %s1073_s13, 4  ;;  %s1078_s30 = int_to_ptr.hbm [resolvable:$true] %s1077_s30 }
  0x76   : > { %605 = vmatpush.msra.mxu1 %v579_v6  ;;  %v1378_v36 = vld [vmem:[%s2065_s8] ss:$0 sm:$0xff]  ;;  %s1620_s27 = sshra.s32 %s1078_s30, 4  ;;  %s1621_s27 = int_to_ptr.hbm [resolvable:$true] %s1620_s27 }
  0x77   : > { %573 = vmatpush.msra.mxu0 %v546_v7  ;;  %1252 = vmatmul.msk.f32.vlgmr.msra.gmra.mxu1 %vm554_vm0, %v578_v8  ;;  %s1622_s21 = scalar_lea.hbm %s1621_s27, 8  ;;  %p1627_p8 = scmp.lt.s32.totalorder %s1621_s27, %s2068_s11 }
  0x78   : > { %1251 = vmatmul.msk.f32.vlgmr.msra.gmra.mxu0 %vm554_vm0, %v545_v9  ;;  %636 = vmatpush.msra.mxu2 %v612_v24  ;;  %p1623_p12 = scmp.ne.s32.totalorder %s1621_s27, %s1622_s21  ;;  %p1628_p10 = scmp.lt.s32.totalorder %s1626_s26, %s1622_s21 }
  0x7a   : > { %637 = vmatpush.msra.mxu2 %v611_v25  ;;  %p1624_p2 = pnand %p1623_p12, %p1834_p4  ;;  %p1629_p6 = por %p1628_p10, %p1627_p8 }
  0x7b   : > { %1253 = vmatmul.msk.f32.vlgmr.msra.gmra.mxu2 %vm554_vm0, %v610_v26 }
  0x7c   : > { %p1625_p1 = pneg %p1624_p2 }
  0x7e   : > { %p1630_p11 = pnand %p1629_p6, %p1625_p1 }
  0xf4   : > { %v607_v12 = vpop.f32.mrf.mxu1 }
  0xf5   : > { %v575_v13 = vpop.f32.mrf.mxu0  ;;  %v608_v14 = vadd.f32 %v1376_v10, %v607_v12 }
  0xf6   : > { %v576_v15 = vadd.f32 %v1377_v11, %v575_v13 }
  0xf7   : > { %848 = vrot.lane.b32.xlu2 %v608_v14, %s1692_s20  ;;  %720 = vrot.lane.b32.xlu1 %v608_v14, %s1693_s1 }
  0xf8   : > { %1254 = vmatpush.xpose.msk.msra.mxu3 %vm642_vm1, %v608_v14 }
  0xfb   : > { %1255 = vmatmul.msk.f32.vlgmr.msra.gmra.mxu3 %vm642_vm1, %v576_v15 }
  0xfe   : > { %v639_v37 = vpop.f32.mrf.mxu2 }
  0xff   : > { %953 = vrot.lane.b32.xlu2 %v608_v14, %s1694_s9  ;;  %718 = vrot.lane.b32.xlu1 %v576_v15, %s1693_s1  ;;  %v1983_v38 = vadd.f32 %v1378_v36, %v639_v37 }
 0x101   : > { %712 = vmatpush.msrb.mxu3 %v1983_v38 }
 0x103   : > { %841 = vmatpush.msra.mxu3 %v717_v39 }
 0x107   : > { %951 = vrot.lane.b32.xlu1 %v576_v15, %s1694_s9 }
 0x151   : > { %v849_v17 = vpop.permute.xlu2 %848 }
 0x159   : > { %v954_v35 = vpop.permute.xlu2 %953 }
 0x169   : > { %v721_v16 = vpop.permute.xlu1 %720 }
 0x16a   : > { %1257 = vmatpush.xpose.msk.msrb.mxu0 %vm642_vm1, %v721_v16 }
 0x16e   : > { %1262 = vmatpush.xpose.msk.msra.mxu0 %vm642_vm1, %v849_v17 }
 0x171   : > { %v719_v18 = vpop.permute.xlu1 %718 }
 0x172   : > { %1258 = vmatmul.msk.f32.vlgmr.msrb.gmra.mxu0 %vm642_vm1, %v719_v18 }
 0x179   : > { %v952_v62 = vpop.permute.xlu1 %951 }
 0x17e   : > { %v666_v19 = vpop.f32.mrf.mxu3 }
 0x17f   : > { %v669_v20 = vmul.f32 0.35355338, %v666_v19 }
 0x181   : > { %v670_v21 = vsel %vm642_vm1, %v669_v20, -inf }
 0x182   : > { %671 = vmax.xlane.f32.xlu0 %v670_v21 }
 0x1ef   : > { %v743_v27 = vpop.f32.mrf.mxu0 }
 0x1f0   : > { %v746_v28 = vmul.f32 0.35355338, %v743_v27 }
 0x1f2   : > { %v747_v29 = vsel %vm642_vm1, %v746_v28, -inf }
 0x1f3   : > { %748 = vmax.xlane.f32.xlu2 %v747_v29 }
 0x1f5   : > { %v672_v30 = vpop.xlane.xlu0 %671 }
 0x1f6   : > { %v673_v31 = vsub.f32 %v669_v20, %v672_v30 }
 0x1f8   : > { %v674_v32 = vmul.f32 1.442695, %v673_v31 }
 0x1fa   : > { %1380 = vpow2.f32 %v674_v32 }
 0x200   : > { %v1381_v33 = vpop.eup %1380 }
 0x201   : > { %v676_v34 = vsel %vm642_vm1, %v1381_v33, 0.0 }
 0x202   : > { %677 = vadd.xlane.f32.xlu0 %v676_v34 }
 0x216   : > { %846 = vrot.lane.b32.xlu0 %v576_v15, %s1692_s20 }
 0x266   : > { %v749_v40 = vpop.xlane.xlu2 %748 }
 0x267   : > { %v750_v41 = vsub.f32 %v746_v28, %v749_v40  ;;  %v799_v28 = vld [vmem:[#allocation13 + $0x8] sm:$0xff] }
 0x268   : > { %818 = vmatpush.msrb.mxu2 %v799_v28 }
 0x269   : > { %v751_v42 = vmul.f32 1.442695, %v750_v41 }
 0x26b   : > { %1382 = vpow2.f32 %v751_v42 }
 0x271   : > { %v1986_v43 = vpop.eup %1382 }
 0x272   : > { %v753_v44 = vsel %vm642_vm1, %v1986_v43, 0.0 }
 0x273   : > { %754 = vadd.xlane.f32.xlu2 %v753_v44 }
 0x275   : > { %v678_v45 = vpop.xlane.xlu0 %677 }
 0x276   : > { %1384 = vrcp.f32 %v678_v45  ;;  %v690_v49 = vand.u32 2147483648, %v678_v45  ;;  %v688_v51 = vand.u32 2147483647, %v678_v45  ;;  %vm684_vm3 = vweird.f32 %v678_v45 }
 0x278   : > { %v691_v53 = vor.u32 1.1754944e-38, %v690_v49  ;;  %vm689_vm5 = vcmp.eq.f32.partialorder %v688_v51, 8.507059e+37 }
 0x27c   : > { %v1385_v46 = vpop.eup %1384 }
 0x27d   : > { %v680_v47 = vmul.f32 %v1385_v46, %v678_v45  ;;  %vm685_vm2 = vweird.f32 %v1385_v46 }
 0x27e   : > { %vm686_vm4 = vmor %vm684_vm3, %vm685_vm2 }
 0x27f   : > { %v681_v48 = vsub.f32 1.0, %v680_v47 }
 0x281   : > { %v682_v50 = vmul.f32 %v1385_v46, %v681_v48 }
 0x283   : > { %v683_v52 = vadd.f32 %v1385_v46, %v682_v50 }
 0x285   : > { %v687_v54 = vsel %vm686_vm4, %v1385_v46, %v683_v52 }
 0x286   : > { %v692_v55 = vsel %vm689_vm5, %v691_v53, %v687_v54  ;;  %v1031_v54 = vld [vmem:[#allocation13 + $0x18] sm:$0xff] }
 0x287   : > { %v693_v56 = vmul.f32 %v1381_v33, %v692_v55  ;;  %v926_v55 = vld [vmem:[#allocation13 + $0x10] sm:$0xff] }
 0x288   : > { %v847_v57 = vpop.permute.xlu0 %846  ;;  %945 = vmatpush.msra.mxu2 %v926_v55 }
 0x289   : > { %1256 = vmatmul.msk.f32.vlgmr.msrb.gmra.mxu3 %vm642_vm1, %v693_v56  ;;  %1263 = vmatmul.msk.f32.vlgmr.msra.gmra.mxu0 %vm642_vm1, %v847_v57 }
 0x28a   : > { %1266 = vmatpush.xpose.msk.msrb.mxu3 %vm642_vm1, %v954_v35 }
 0x2e6   : > { %v755_v8 = vpop.xlane.xlu2 %754 }
 0x2e7   : > { %v767_v14 = vand.u32 2147483648, %v755_v8  ;;  %vm761_vm7 = vweird.f32 %v755_v8  ;;  %v765_v15 = vand.u32 2147483647, %v755_v8 }
 0x2e9   : > { %v768_v18 = vor.u32 1.1754944e-38, %v767_v14  ;;  %vm766_vm9 = vcmp.eq.f32.partialorder %v765_v15, 8.507059e+37 }
 0x306   : > { %v871_v58 = vpop.f32.mrf.mxu0 }
 0x307   : > { %v874_v59 = vmul.f32 0.35355338, %v871_v58 }
 0x309   : > { %v875_v60 = vsel %vm642_vm1, %v874_v59, -inf }
 0x30a   : > { %876 = vmax.xlane.f32.xlu1 %v875_v60 }
 0x30c   : > { %v714_v61 = vpop.f32.mrf.mxu3 }
 0x30d   : > { %1261 = vmatmul.msk.f32.vlgmr.msra.gmra.mxu3 %vm642_vm1, %v714_v61 }
 0x315   : > { %1267 = vmatmul.msk.f32.vlgmr.msrb.gmra.mxu3 %vm642_vm1, %v952_v62  ;;  %v1379_v62 = vld [vmem:[%s2067_s10] ss:$0 sm:$0xff] }
 0x37d   : > { %v877_v63 = vpop.xlane.xlu1 %876 }
 0x37e   : > { %v878_v0 = vsub.f32 %v874_v59, %v877_v63 }
 0x380   : > { %v879_v1 = vmul.f32 1.442695, %v878_v0 }
 0x382   : > { %1386 = vpow2.f32 %v879_v1 }
 0x383   : > { %1388 = vrcp.f32 %v755_v8 }
 0x388   : > { %v1996_v2 = vpop.eup %1386 }
 0x389   : > { %v881_v3 = vsel %vm642_vm1, %v1996_v2, 0.0  ;;  %v1389_v9 = vpop.eup %1388 }
 0x38a   : > { %882 = vadd.xlane.f32.xlu2 %v881_v3  ;;  %v757_v10 = vmul.f32 %v1389_v9, %v755_v8  ;;  %vm762_vm6 = vweird.f32 %v1389_v9 }
 0x38b   : > { %vm763_vm8 = vmor %vm761_vm7, %vm762_vm6 }
 0x38c   : > { %v758_v11 = vsub.f32 1.0, %v757_v10 }
 0x38e   : > { %v759_v12 = vmul.f32 %v1389_v9, %v758_v11 }
 0x390   : > { %v2000_v4 = vpop.f32.mrf.mxu3  ;;  %v760_v13 = vadd.f32 %v1389_v9, %v759_v12 }
 0x392   : > { %v764_v17 = vsel %vm763_vm8, %v1389_v9, %v760_v13 }
 0x393   : > { %v769_v19 = vsel %vm766_vm9, %v768_v18, %v764_v17 }
 0x394   : > { %v770_v21 = vmul.f32 %v1986_v43, %v769_v19 }
 0x398   : > { %v976_v5 = vpop.f32.mrf.mxu3 }
 0x399   : > { %v979_v6 = vmul.f32 0.35355338, %v976_v5 }
 0x39b   : > { %v980_v7 = vsel %vm642_vm1, %v979_v6, -inf }
 0x39c   : > { %981 = vmax.xlane.f32.xlu0 %v980_v7 }
 0x3a2   : > { %772 = vrot.lane.b32.xlu2 %v1983_v38, %s1693_s1 }
 0x3b0   : > { %1004 = vrot.lane.b32.xlu0 %v1983_v38, %s1694_s9 }
 0x3fd   : > { %v883_v16 = vpop.xlane.xlu2 %882 }
 0x3fe   : > { %v895_v43 = vand.u32 2147483648, %v883_v16  ;;  %vm889_vm14 = vweird.f32 %v883_v16  ;;  %v893_v45 = vand.u32 2147483647, %v883_v16 }
 0x400   : > { %v896_v50 = vor.u32 1.1754944e-38, %v895_v43  ;;  %vm894_vm3 = vcmp.eq.f32.partialorder %v893_v45, 8.507059e+37 }
 0x405   : > { %v773_v20 = vpop.permute.xlu2 %772 }
 0x406   : > { %793 = vmatpush.msrb.mxu1 %v773_v20 }
 0x407   : > { %1259 = vmatmul.msk.f32.vlgmr.msrb.gmra.mxu1 %vm642_vm1, %v770_v21 }
 0x40f   : > { %v982_v22 = vpop.xlane.xlu0 %981 }
 0x410   : > { %v983_v23 = vsub.f32 %v979_v6, %v982_v22 }
 0x412   : > { %v984_v24 = vmul.f32 1.442695, %v983_v23 }
 0x414   : > { %1390 = vpow2.f32 %v984_v24 }
 0x415   : > { %1392 = vrcp.f32 %v883_v16 }
 0x41a   : > { %v1391_v25 = vpop.eup %1390 }
 0x41b   : > { %v986_v26 = vsel %vm642_vm1, %v1391_v25, 0.0  ;;  %v1393_v30 = vpop.eup %1392 }
 0x41c   : > { %987 = vadd.xlane.f32.xlu1 %v986_v26  ;;  %v885_v32 = vmul.f32 %v1393_v30, %v883_v16  ;;  %vm890_vm11 = vweird.f32 %v1393_v30 }
 0x41d   : > { %vm891_vm2 = vmor %vm889_vm14, %vm890_vm11 }
 0x41e   : > { %v886_v33 = vsub.f32 1.0, %v885_v32 }
 0x420   : > { %v887_v36 = vmul.f32 %v1393_v30, %v886_v33 }
 0x422   : > { %v1005_v27 = vpop.permute.xlu0 %1004 }
 0x423   : > { %1025 = vmatpush.msrb.mxu0 %v1005_v27 }
 0x435   : > { %899 = vrot.lane.b32.xlu1 %v1983_v38, %s1692_s20  ;;  %v888_v38 = vadd.f32 %v1393_v30, %v887_v36 }
 0x437   : > { %v892_v48 = vsel %vm891_vm2, %v1393_v30, %v888_v38 }
 0x438   : > { %v897_v51 = vsel %vm894_vm3, %v896_v50, %v892_v48 }
 0x439   : > { %v898_v53 = vmul.f32 %v1996_v2, %v897_v51 }
 0x484   : > { %v795_v29 = vpop.f32.mrf.mxu1 }
 0x485   : > { %1260 = vmatmul.msk.f32.vlgmr.msrb.gmra.mxu2 %vm642_vm1, %v795_v29 }
 0x48f   : > { %v988_v31 = vpop.xlane.xlu1 %987 }
 0x490   : > { %1394 = vrcp.f32 %v988_v31  ;;  %v1000_v39 = vand.u32 2147483648, %v988_v31  ;;  %v998_v41 = vand.u32 2147483647, %v988_v31  ;;  %vm994_vm12 = vweird.f32 %v988_v31 }
 0x492   : > { %v1001_v44 = vor.u32 1.1754944e-38, %v1000_v39  ;;  %vm999_vm15 = vcmp.eq.f32.partialorder %v998_v41, 8.507059e+37 }
 0x496   : > { %v1395_v34 = vpop.eup %1394 }
 0x497   : > { %v990_v35 = vmul.f32 %v1395_v34, %v988_v31  ;;  %vm995_vm10 = vweird.f32 %v1395_v34 }
 0x498   : > { %vm996_vm13 = vmor %vm994_vm12, %vm995_vm10 }
 0x499   : > { %v991_v37 = vsub.f32 1.0, %v990_v35 }
 0x49b   : > { %v992_v40 = vmul.f32 %v1395_v34, %v991_v37 }
 0x49d   : > { %v993_v42 = vadd.f32 %v1395_v34, %v992_v40 }
 0x49f   : > { %v997_v46 = vsel %vm996_vm13, %v1395_v34, %v993_v42 }
 0x4a0   : > { %v1002_v47 = vsel %vm999_vm15, %v1001_v44, %v997_v46 }
 0x4a1   : > { %v1003_v49 = vmul.f32 %v1391_v25, %v1002_v47 }
 0x4a3   : > { %1268 = vmatmul.msk.f32.vlgmr.msrb.gmra.mxu0 %vm642_vm1, %v1003_v49 }
 0x4a7   : > { %v900_v52 = vpop.permute.xlu1 %899 }
 0x4a8   : > { %920 = vmatpush.msra.mxu1 %v900_v52 }
 0x4a9   : > { %1264 = vmatmul.msk.f32.vlgmr.msra.gmra.mxu1 %vm642_vm1, %v898_v53 }
 0x4aa   : > { %1050 = vmatpush.msrb.mxu1 %v1031_v54 }
 0x508   : > { %v820_v58 = vpop.f32.mrf.mxu2 }
 0x509   : > { %v844_v59 = vadd.f32 %v2000_v4, %v820_v58 }
 0x520   : > { %v1027_v56 = vpop.f32.mrf.mxu0 }
 0x521   : > { %1269 = vmatmul.msk.f32.vlgmr.msrb.gmra.mxu1 %vm642_vm1, %v1027_v56 }
 0x526   : > { %v922_v57 = vpop.f32.mrf.mxu1 }
 0x527   : > { %1265 = vmatmul.msk.f32.vlgmr.msra.gmra.mxu2 %vm642_vm1, %v922_v57 }
 0x59e   : > { %v1052_v63 = vpop.f32.mrf.mxu1 }
 0x5aa   : > { %v947_v60 = vpop.f32.mrf.mxu2 }
 0x5ab   : > { %v950_v61 = vadd.f32 %v947_v60, %v844_v59 }
 0x5ad   : > { %v1055_v0 = vadd.f32 %v1052_v63, %v950_v61 }
 0x5af   : > { %v1060_v1 = vadd.f32 %v1379_v62, %v1055_v0 }
 0x5b1   : > { %1061 = vst.msk [vmem:[%s544_s29] sm:$0xff] %vm554_vm0, %v1060_v1 }
 0x5b2   : > { %1633 = shalt.err (!%p1630_p11)
}
 0x5b3   : > { %1296 = dma.vmem_to_hbm [thread:$0]  (%p1834_p4), %s1076_s28, 128, %s1078_s30, %s1063_s24  }
 0x5b4 PF: > { %s2112_s14 = sld [smem:[#allocation20_spill]] }
 0x5b5   : > { %s2114_s5 = sld [smem:[#allocation21_spill]] }
 0x5ba   : > { %s1089_s12 = sand.u32 1, %s2112_s14  }
 0x5bb   : > { %p2115_p13 = scmp.ge.s32.totalorder %s2114_s5, 2  ;;  %s1090_s16 = scalar_lea.sflag [#allocation4], %s1089_s12 }
 0x5bd   : > { %p1322_p3 = pnand %p2115_p13, %p1838_p5 }
 0x5bf   : > { %p1323_p7 = pneg %p1322_p3 }
 0x5c1   : > { %1667 = dma.done.wait (%p1323_p7), %s1090_s16, 128  }
 0x5c2   : > { %1669 = vsyncadd (%p1323_p7), %s1090_s16, 4294967168  ;;  %s2116_s20 = sld [smem:[#allocation22_spill]]  ;;  %s2118_s17 = smov %s1676_s18 }
 0x5c3   : > { %s2117_s4 = sld [smem:[#allocation23_spill]]  ;;  %s2119_s18 = smov %s1680_s19 }
 0x5c8   : > { %p29_p9 = scmp.ge.s32.totalorder %s2116_s20, 4  }
 0x5c9   : > { %s2120_s19 = smov %s2117_s4 }
 0x5ca   :  { %31 = sbr.rel (!%p29_p9) target bundleno = 15 (0xf), region = 152 }
 0x5cf   :  { %1096 = vsyncpa [#allocation3], 1 }
 0x5d0   :  { %1098 = vsyncpa [#allocation3 + $0x1], 1 }
 0x5d1   :  { %1099 = vsyncpa [#allocation6], 1 }
 0x5d2   :  { %1101 = vsyncpa [#allocation6 + $0x1], 1 }
 0x5d3   :  { %1102 = vsyncpa [#allocation9], 1 }
 0x5d4   :  { %1103 = vsyncpa [#allocation12], 1 }
 0x5d5   :  { %1104 = vsyncpa [#allocation4], 1 }
 0x5d6   :  { %1106 = vsyncpa [#allocation4 + $0x1], 1 }

</bundles_post_ra>
